<compile_context>
chip_gen: v7x
topology: tpu7x:2x2x1
jax: 0.10.0
libtpu: 0.0.40
codegen_flags: <defaults>
</compile_context>

<pallas_src>
import functools

import jax
import jax.numpy as jnp
from jax.experimental import pallas as pl
from jax.experimental.pallas import tpu as pltpu

HIDDEN = 64          # logical hidden size (matches the torch module)
HIDDEN_PAD = 128     # lane-dense padded hidden
LANE = 128           # TPU lane width


def mlp_kernel(x_ref, w1_ref, b1_ref, w2_ref, b2_ref, o_ref):
    # x: (TB, IN) bf16, w1: (IN, Hp) bf16, b1: (1, Hp) f32,
    # w2: (Hp, OUT) bf16, b2: (1, OUT) f32, o: (TB, OUT) f32
    h = jnp.dot(x_ref[...], w1_ref[...], preferred_element_type=jnp.float32)
    h = jnp.maximum(h + b1_ref[...], 0.0)                        # f32 ReLU on the VPU
    y = jnp.dot(h.astype(w2_ref.dtype), w2_ref[...],
                preferred_element_type=jnp.float32) + b2_ref[...]
    o_ref[...] = y.astype(o_ref.dtype)                           # real-width store


def neural_network_forward(x, w1p, b1p, w2p, b2p, out_features, *,
                           block_b=2048, gridless_max_rows=2048):
    """Forward pass. w1p/w2p are bf16 (hidden zero-padded to 128), b1p/b2p are f32."""
    B, IN = x.shape
    Hp = w1p.shape[1]
    OUT = w2p.shape[1]
    assert OUT == out_features

    # Feed the MXU bf16 operands; accumulation stays f32 inside the kernel.
    # (Production callers should hand us x already in bf16 to skip this cast.)
    x = x.astype(w1p.dtype)

    param_bytes = sum(a.size * a.dtype.itemsize for a in (w1p, b1p, w2p, b2p))
    vmem_spec = pl.BlockSpec(memory_space=pltpu.MemorySpace.VMEM)

    if B <= gridless_max_rows:
        # Small/medium batch: one grid-less call, everything VMEM resident.
        # Bucket B to the next power of two (>= 8) so serving does not recompile
        # for every distinct batch size.
        Bp = max(8, pl.next_power_of_2(B))
        if Bp != B:
            x = jnp.pad(x, ((0, Bp - B), (0, 0)))
        cost = pl.CostEstimate(
            flops=2 * Bp * (IN * Hp + Hp * OUT),
            transcendentals=0,
            bytes_accessed=Bp * IN * x.dtype.itemsize + param_bytes + Bp * OUT * 4,
        )
        out = pl.pallas_call(
            mlp_kernel,
            out_shape=jax.ShapeDtypeStruct((Bp, OUT), jnp.float32),
            in_specs=[vmem_spec] * 5,
            out_specs=vmem_spec,
            cost_estimate=cost,
        )(x, w1p, b1p, w2p, b2p)
        return out[:B]

    # Large batch: tile only the batch axis; partial last tile handled by Pallas
    # (OOB rows never written back), so no wrapper-side jnp.pad of x. Weights and
    # biases use a constant index_map -> stay VMEM resident across the whole grid.
    grid = (pl.cdiv(B, block_b),)
    cost = pl.CostEstimate(
        flops=2 * B * (IN * Hp + Hp * OUT),
        transcendentals=0,
        bytes_accessed=B * IN * x.dtype.itemsize + param_bytes + B * OUT * 4,
    )
    out = pl.pallas_call(
        mlp_kernel,
        out_shape=jax.ShapeDtypeStruct((B, OUT), jnp.float32),
        grid=grid,
        in_specs=[
            pl.BlockSpec((block_b, IN), lambda i: (i, 0)),   # IN == full dim -> legal
            pl.BlockSpec((IN, Hp), lambda i: (0, 0)),
            pl.BlockSpec((1, Hp), lambda i: (0, 0)),
            pl.BlockSpec((Hp, OUT), lambda i: (0, 0)),       # OUT == full dim -> legal
            pl.BlockSpec((1, OUT), lambda i: (0, 0)),
        ],
        out_specs=pl.BlockSpec((block_b, OUT), lambda i: (i, 0)),
        compiler_params=pltpu.CompilerParams(
            # TODO(synk): on v7x, use pltpu.CORE_PARALLEL (or core_map over
            # create_tensorcore_mesh) to guarantee both TensorCores split the tiles.
            dimension_semantics=(pltpu.PARALLEL,),
        ),
        cost_estimate=cost,
    )(x, w1p, b1p, w2p, b2p)
    return out


def init_params(key, input_layer, output_layer, hidden=HIDDEN,
                compute_dtype=jnp.bfloat16):
    """Torch-nn.Linear-style uniform init; returns logical (f32) and padded
    (bf16 weights / f32 biases) parameters."""
    k1, k2, k3, k4 = jax.random.split(key, 4)
    bound1 = 1.0 / jnp.sqrt(input_layer)
    bound2 = 1.0 / jnp.sqrt(hidden)
    w1 = jax.random.uniform(k1, (input_layer, hidden), jnp.float32, -bound1, bound1)
    b1 = jax.random.uniform(k2, (1, hidden), jnp.float32, -bound1, bound1)
    w2 = jax.random.uniform(k3, (hidden, output_layer), jnp.float32, -bound2, bound2)
    b2 = jax.random.uniform(k4, (1, output_layer), jnp.float32, -bound2, bound2)

    # Zero-pad only the hidden dim (64 -> 128): exact through ReLU and both dots.
    # The output dim is NOT padded: real-width lane-masked stores beat 16x the HBM
    # write traffic plus a strided wrapper slice when out_features << 128.
    w1p = jnp.pad(w1, ((0, 0), (0, HIDDEN_PAD - hidden))).astype(compute_dtype)
    b1p = jnp.pad(b1, ((0, 0), (0, HIDDEN_PAD - hidden)))           # stays f32
    w2p = jnp.pad(w2, ((0, HIDDEN_PAD - hidden), (0, 0))).astype(compute_dtype)
    b2p = b2                                                        # stays f32
    return (w1, b1, w2, b2), (w1p, b1p, w2p, b2p)


if __name__ == "__main__":
    key = jax.random.PRNGKey(0)
    kx, kp, kx2 = jax.random.split(key, 3)

    input_layer, output_layer = 32, 8
    (w1, b1, w2, b2), padded = init_params(kp, input_layer, output_layer)

    fwd = jax.jit(functools.partial(neural_network_forward,
                                    out_features=output_layer))

    # Reference matching the kernel's numerics (bf16 operands, f32 accumulation).
    def ref_bf16(x):
        xb = x.astype(jnp.bfloat16).astype(jnp.float32)
        w1b = w1.astype(jnp.bfloat16).astype(jnp.float32)
        w2b = w2.astype(jnp.bfloat16).astype(jnp.float32)
        h = jnp.maximum(xb @ w1b + b1, 0.0)
        return h.astype(jnp.bfloat16).astype(jnp.float32) @ w2b + b2

    # Pure-f32 module reference (semantics sanity check, loose tolerance for bf16).
    def ref_f32(x):
        return jnp.maximum(x @ w1 + b1, 0.0) @ w2 + b2

    # 1) small batch -> grid-less, fully VMEM-resident path
    x_small = jax.random.normal(kx, (8, input_layer), jnp.float32)
    out_small = fwd(x_small, *padded)
    jax.block_until_ready(out_small)
    assert out_small.shape == (8, output_layer)
    assert jnp.allclose(out_small, ref_bf16(x_small), atol=1e-2, rtol=1e-2)
    assert jnp.allclose(out_small, ref_f32(x_small), atol=1e-1, rtol=1e-1)

    # 2) large batch -> batch-tiled grid with a partial last tile (no x padding)
    x_large = jax.random.normal(kx2, (3000, input_layer), jnp.float32)
    out_large = fwd(x_large, *padded)
    jax.block_until_ready(out_large)
    assert out_large.shape == (3000, output_layer)
    assert jnp.allclose(out_large, ref_bf16(x_large), atol=1e-2, rtol=1e-2)

    print("KERNEL_OK")
</pallas_src>

<mosaic_0001>
module attributes {stable_mosaic.version = 11 : i64} {
  func.func @mlp_kernel(%arg0: memref<8x32xbf16, #tpu.memory_space<vmem>>, %arg1: memref<32x128xbf16, #tpu.memory_space<vmem>>, %arg2: memref<1x128xf32, #tpu.memory_space<vmem>>, %arg3: memref<128x8xbf16, #tpu.memory_space<vmem>>, %arg4: memref<1x8xf32, #tpu.memory_space<vmem>>, %arg5: memref<8x8xf32, #tpu.memory_space<vmem>>) attributes {dimension_semantics = [], scalar_prefetch = 0 : i64, scratch_operands = 0 : i64, tpu.core_type = #tpu.core_type<tc>} {
    %c0 = arith.constant 0 : index
    %c0_0 = arith.constant 0 : index
    %0 = vector.load %arg0[%c0, %c0_0] : memref<8x32xbf16, #tpu.memory_space<vmem>>, vector<8x32xbf16>
    %c0_1 = arith.constant 0 : index
    %c0_2 = arith.constant 0 : index
    %1 = vector.load %arg1[%c0_1, %c0_2] : memref<32x128xbf16, #tpu.memory_space<vmem>>, vector<32x128xbf16>
    %cst = arith.constant dense<0.000000e+00> : vector<8x128xf32>
    %2 = tpu.matmul %0, %1, %cst {dimension_numbers = #tpu.dot_dimension_numbers<[1], [0], [0], [1], [0, 0, 1, 1], [], []>} : vector<8x32xbf16>, vector<32x128xbf16>, vector<8x128xf32> -> vector<8x128xf32>
    %c0_3 = arith.constant 0 : index
    %c0_4 = arith.constant 0 : index
    %3 = vector.load %arg2[%c0_3, %c0_4] : memref<1x128xf32, #tpu.memory_space<vmem>>, vector<1x128xf32>
    %4 = vector.broadcast %3 : vector<1x128xf32> to vector<8x128xf32>
    %5 = arith.addf %2, %4 : vector<8x128xf32>
    %cst_5 = arith.constant 0.000000e+00 : f32
    %6 = vector.broadcast %cst_5 : f32 to vector<8x128xf32>
    %7 = arith.maximumf %5, %6 : vector<8x128xf32>
    %8 = arith.truncf %7 : vector<8x128xf32> to vector<8x128xbf16>
    %c0_6 = arith.constant 0 : index
    %c0_7 = arith.constant 0 : index
    %9 = vector.load %arg3[%c0_6, %c0_7] : memref<128x8xbf16, #tpu.memory_space<vmem>>, vector<128x8xbf16>
    %cst_8 = arith.constant dense<0.000000e+00> : vector<8x8xf32>
    %10 = tpu.matmul %8, %9, %cst_8 {dimension_numbers = #tpu.dot_dimension_numbers<[1], [0], [0], [1], [0, 0, 1, 1], [], []>} : vector<8x128xbf16>, vector<128x8xbf16>, vector<8x8xf32> -> vector<8x8xf32>
    %c0_9 = arith.constant 0 : index
    %c0_10 = arith.constant 0 : index
    %11 = vector.load %arg4[%c0_9, %c0_10] : memref<1x8xf32, #tpu.memory_space<vmem>>, vector<1x8xf32>
    %12 = vector.broadcast %11 : vector<1x8xf32> to vector<8x8xf32>
    %13 = arith.addf %10, %12 : vector<8x8xf32>
    %c0_11 = arith.constant 0 : index
    %c0_12 = arith.constant 0 : index
    %14 = vector.load %arg5[%c0_11, %c0_12] : memref<8x8xf32, #tpu.memory_space<vmem>>, vector<8x8xf32>
    tpu.vector_store %arg5[%c0_11, %c0_12], %13 {strides = array<i32>} : memref<8x8xf32, #tpu.memory_space<vmem>>, vector<8x8xf32>,
    return
  }
}

</mosaic_0001>

<bundles_post_ra>
// kernel: neural_network_forward.1
= control target key start
LH: loop header
LB: loop body
LE: loop exit
PB: predicated region body
PF: predicated region fallthrough
CT: control target
= control target key end

     0   :  { %v309_v1 = vmov 0.0   ;;  %vm310_vm0 = vmmov 0   ;;  %vm46_vm1 = vcmask 261120   ;;  %s393_s0 = inlined_call_operand.vmem [shape: bf16[8,32], index: 0, kind: input, shape index: {}]   ;;  %s394_s1 = inlined_call_operand.vmem [shape: bf16[32,128], index: 1, kind: input, shape index: {}]   ;;  %s395_s2 = inlined_call_operand.vmem [shape: f32[1,128], index: 2, kind: input, shape index: {}]   ;;  %s396_s3 = inlined_call_operand.vmem [shape: bf16[128,8], index: 3, kind: input, shape index: {}]   ;;  %s397_s4 = inlined_call_operand.vmem [shape: f32[1,8], index: 4, kind: input, shape index: {}]   ;;  %s398_s5 = inlined_call_operand.hbm [shape: f32[8,8], index: 5, kind: output, shape index: {}]  }
   0x1   :  { %v275_v0 = vld [vmem:[%s394_s1] sm:$0xff]   ;;  %244 = vmatprep.subr.bf16.mxu0 %v309_v1  ;;  %252 = vmatprep.subr.bf16.mxu1 %v309_v1  ;;  %v276_v2 = vld [vmem:[%s394_s1 + $0x8] sm:$0xff]   ;;  %v279_v6 = vld [vmem:[%s396_s3 + $0x10] sm:$0xff]  }
   0x2   :  { %245 = vmatpush3.bf16.msra.mxu0 %v275_v0  ;;  %248 = vmatprep.mubr.msk.bf16.mxu0 %vm310_vm0, %v309_v1  ;;  %v277_v3 = vld [vmem:[%s396_s3] sm:$0xff]   ;;  %v278_v4 = vld [vmem:[%s396_s3 + $0x8] sm:$0xff]  }
   0x3   :  { %246 = vmatprep.subr.bf16.mxu0 %v309_v1  ;;  %268 = vmatprep.mubr.msk.bf16.mxu1 %vm310_vm0, %v309_v1  ;;  %v22_v5 = vld [vmem:[%s393_s0] sm:$0xf] }
   0x4   :  { %253 = vmatpush3.bf16.msra.mxu1 %v277_v3 }
   0x5   :  { %254 = vmatprep.subr.bf16.mxu1 %v309_v1 }
   0x6   :  { %247 = vmatpush3.bf16.msra.mxu0 %v276_v2 }
   0x8   :  { %255 = vmatpush3.bf16.msra.mxu1 %v278_v4 }
   0x9   :  { %249 = vmatmul.mubr.msk.bf16.vlgmr.msra.gmra.mrb[0].mxu0 %vm46_vm1, %v22_v5  ;;  %256 = vmatprep.subr.bf16.mxu1 %v309_v1 }
   0xa   :  { %10 = vsyncpa [#allocation3], 0  ;;  %v280_v7 = vld [vmem:[%s396_s3 + $0x18] sm:$0xff]   ;;  %v281_v8 = vld [vmem:[%s396_s3 + $0x20] sm:$0xff]   ;;  %s311_s17 = smov [#allocation2]   ;;  %vm203_vm2 = vcmask 64512  }
   0xb   :  { %v282_v9 = vld [vmem:[%s396_s3 + $0x28] sm:$0xff]   ;;  %v283_v10 = vld [vmem:[%s396_s3 + $0x30] sm:$0xff]   ;;  %v284_v11 = vld [vmem:[%s396_s3 + $0x38] sm:$0xff]   ;;  %s211_s18 = sshll.u32 %s311_s17, 4  ;;  %s212_s18 = int_to_ptr.vmem [resolvable:$true] %s211_s18 }
   0xc   :  { %257 = vmatpush3.bf16.msra.mxu1 %v279_v6  ;;  %v219_v12 = vld [vmem:[%s395_s2] ss:$0 sm:$0xff]  ;;  %s285_s2 = scalar_lea.vmem %s212_s18, 128  ;;  %p290_p1 = scmp.lt.s32.totalorder %s212_s18, %s212_s18 }
   0xd   :  { %258 = vmatprep.subr.bf16.mxu1 %v309_v1  ;;  %v223_v20 = vld [vmem:[%s397_s4] ss:$0 sm:$0xff]  ;;  %p286_p0 = scmp.ne.s32.totalorder %s212_s18, %s285_s2  ;;  %p291_p2 = scmp.lt.s32.totalorder %s285_s2, %s285_s2 }
   0xf   :  { %p292_p3 = por %p291_p2, %p290_p1 }
  0x10   :  { %259 = vmatpush3.bf16.msra.mxu1 %v280_v7 }
  0x11   :  { %260 = vmatprep.subr.bf16.mxu1 %v309_v1  ;;  %p293_p4 = pnand %p292_p3, %p286_p0 }
  0x14   :  { %261 = vmatpush3.bf16.msra.mxu1 %v281_v8 }
  0x15   :  { %262 = vmatprep.subr.bf16.mxu1 %v309_v1 }
  0x18   :  { %263 = vmatpush3.bf16.msra.mxu1 %v282_v9 }
  0x19   :  { %264 = vmatprep.subr.bf16.mxu1 %v309_v1 }
  0x1c   :  { %265 = vmatpush3.bf16.msra.mxu1 %v283_v10 }
  0x1d   :  { %266 = vmatprep.subr.bf16.mxu1 %v309_v1 }
  0x20   :  { %267 = vmatpush3.bf16.msra.mxu1 %v284_v11 }
  0xdc   :  { %v84_v13 = vpop.f32.mrb[0].mxu0 }
  0xdd   :  { %v85_v14 = vadd.f32 %v219_v12, %v84_v13  ;;  %v250_v15 = vpop.f32.mrb[1].mxu0 }
  0xde   :  { %v87_v16 = vpop.f32.mrb[2].mxu0 }
  0xdf   :  { %v90_v17 = vmax.f32 %v85_v14, 0.0  ;;  %v251_v18 = vpop.f32.mrb[3].mxu0 }
  0xe1   :  { %v91_v19 = vpack.c.bf16 %v90_v17, %v90_v17 }
  0xe3   :  { %269 = vmatmul.mubr.bf16.vlgmr.msra.gmra.mrb[0].mxu1 %v91_v19 }
 0x1b6   :  { %v197_v21 = vpop.f32.mrb[0].mxu1 }
 0x1b7   :  { %v198_v22 = vadd.f32 %v223_v20, %v197_v21  ;;  %v270_v23 = vpop.f32.mrb[1].mxu1 }
 0x1b8   :  { %v200_v24 = vpop.f32.mrb[2].mxu1 }
 0x1b9   :  { %v271_v25 = vpop.f32.mrb[3].mxu1  ;;  %204 = vst.msk [vmem:[#allocation2] sm:$0xff] %vm203_vm2, %v198_v22 }
 0x1ba   :  { %296 = shalt.err (!%p293_p4)
}
 0x1bb   :  { %s297_s4 = scalar_lea.hbm %s398_s5, 128 }
 0x1bc   :  { %p298_p5 = scmp.ne.s32.totalorder %s398_s5, %s297_s4  ;;  %p301_p6 = scmp.lt.u32.totalorder %s297_s4, %s398_s5 }
 0x1be   :  { %p303_p7 = pnand %p301_p6, %p298_p5 }
 0x1c0   :  { %306 = shalt.err (!%p303_p7)
}
 0x1c1   :  { %214 = dma.vmem_to_hbm [thread:$0]  %s212_s18, 128, %s398_s5, [#allocation3]  }
 0x1c2   :  { %307 = dma.done.wait [#allocation3], 128  }
 0x1c3   :  { %308 = vsyncadd [#allocation3], 4294967168 }
 0x1c4   :  { %218 = vsyncpa [#allocation3], 1 }

</bundles_post_ra>
